<compile_context>
chip_gen: v5e
topology: v5e:2x2
jax: 0.10.0
libtpu: 0.0.40
codegen_flags: <defaults>
</compile_context>

<pallas_src>
from functools import partial

import numpy as np
import jax
import jax.numpy as jnp
from jax.experimental import pallas as pl
from jax.experimental.pallas import tpu as pltpu

# -----------------------------------------------------------------------------
# Small config consistent with ConvPosEnc(dim=32, k=3) on an 8x8 feature map.
# -----------------------------------------------------------------------------
B = 2
H_IMG = 8
W_IMG = 8
N = H_IMG * W_IMG          # tokens
C = 32                     # dim
K = 3                      # depthwise kernel size (padding = K // 2)


# -----------------------------------------------------------------------------
# Pallas kernel: one grid step per batch-block.
#   x_ref : (R, W*C)        R = batch_block * H rows, lane-dense slab
#   w_ref : (K*K, R, W*C)   depthwise weights, border masks pre-folded,
#                           tiled across W and across batch_block
#   b_ref : (1, W*C)        bias, pre-tiled across W
#   out   : (R, W*C)        depthwise_conv(x) + bias + x
# -----------------------------------------------------------------------------
def _conv_pos_enc_kernel(x_ref, w_ref, b_ref, out_ref, *, k, c):
    x = x_ref[...]                                  # (R, WC)
    w = w_ref[...]                                  # (K*K, R, WC), hoisted load
    r, wc = x.shape

    acc = jnp.zeros_like(x)
    t = 0
    for di in range(k):
        dy = di - k // 2
        # Sublane roll: tap value at row i comes from row i + dy.  Wrap-around
        # (image top/bottom and cross-image rows) is zeroed by the pre-masked
        # weights, so no explicit row mask is needed here.
        x_row = x if dy == 0 else pltpu.roll(x, shift=(-dy) % r, axis=0)
        for dj in range(k):
            dx = dj - k // 2
            # Lane roll: shift by dx image columns = dx * C lanes.  Column
            # wrap-around is likewise zeroed by the pre-masked weights.
            tap = x_row if dx == 0 else pltpu.roll(
                x_row, shift=(-dx * c) % wc, axis=1)
            acc = acc + tap * w[t]                  # 2 VPU ops per tap
            t += 1

    out_ref[...] = x + acc + b_ref[...]             # conv + bias + residual


# -----------------------------------------------------------------------------
# One-time parameter packing (keep OUT of the per-call hot path).
#   weight: (K, K, C) == PyTorch depthwise weight (C, 1, K, K) permuted
#   bias  : (C,)
# Returns:
#   w_packed: (K*K, batch_block*H, W*C) with border masks folded in
#   b_packed: (1, W*C)
# -----------------------------------------------------------------------------
def prepare_conv_pos_enc_params(weight, bias, size, batch_block):
    k = weight.shape[0]
    cc = weight.shape[-1]
    hh, ww = size
    wc = ww * cc
    pad = k // 2

    rows = jnp.arange(hh)
    cols = jnp.arange(ww)
    taps = []
    for di in range(k):
        dy = di - pad
        row_ok = (rows + dy >= 0) & (rows + dy < hh)            # (H,)
        for dj in range(k):
            dx = dj - pad
            col_ok = (cols + dx >= 0) & (cols + dx < ww)        # (W,)
            m = row_ok[:, None, None] & col_ok[None, :, None]   # (H, W, 1)
            wt = jnp.where(m, weight[di, dj][None, None, :], 0.0)  # (H, W, C)
            taps.append(wt.reshape(hh, wc))
    w_packed = jnp.stack(taps, axis=0)                          # (K*K, H, WC)
    w_packed = jnp.tile(w_packed, (1, batch_block, 1))          # (K*K, Bt*H, WC)
    b_packed = jnp.tile(bias, (ww,)).reshape(1, wc)             # (1, WC)
    return (w_packed.astype(jnp.float32), b_packed.astype(jnp.float32))


# -----------------------------------------------------------------------------
# Forward wrapper: only reshapes x (free) and launches one pallas_call.
#   batch_block: images per grid step.  Default = full batch -> grid=(1,).
#   For large B / production feature maps, pick batch_block so the
#   double-buffered (in+out) blocks stay well under VMEM (v7x has 64 MiB);
#   grid axis is "parallel" so v7x's two TensorCores split batch blocks.
# -----------------------------------------------------------------------------
def conv_pos_enc_pallas(x, w_packed, b_packed, size, batch_block=None):
    bsz, ntok, cc = x.shape
    hh, ww = size
    wc = ww * cc
    if batch_block is None:
        batch_block = bsz
    assert bsz % batch_block == 0
    n_blocks = bsz // batch_block
    rows_per_block = batch_block * hh

    kk = w_packed.shape[0]
    k = int(round(kk ** 0.5))
    assert k * k == kk and w_packed.shape[1] == rows_per_block

    x_slab = x.reshape(bsz * hh, wc)                # lane-dense (B*H, W*C)

    out = pl.pallas_call(
        partial(_conv_pos_enc_kernel, k=k, c=cc),
        out_shape=jax.ShapeDtypeStruct((bsz * hh, wc), jnp.float32),
        grid_spec=pltpu.PrefetchScalarGridSpec(
            num_scalar_prefetch=0,
            grid=(n_blocks,),
            in_specs=[
                pl.BlockSpec((rows_per_block, wc), lambda i: (i, 0)),
                pl.BlockSpec((kk, rows_per_block, wc), lambda i: (0, 0, 0)),
                pl.BlockSpec((1, wc), lambda i: (0, 0)),
            ],
            out_specs=pl.BlockSpec((rows_per_block, wc), lambda i: (i, 0)),
        ),
        compiler_params=pltpu.CompilerParams(
            dimension_semantics=("parallel",)),     # batch-block sharding on v7x
    )(x_slab, w_packed, b_packed)

    return out.reshape(bsz, ntok, cc)


# -----------------------------------------------------------------------------
# Pure-JAX reference mirroring the PyTorch forward (independent formulation).
# -----------------------------------------------------------------------------
def conv_pos_enc_ref(x, weight, bias, size):
    bsz, ntok, cc = x.shape
    hh, ww = size
    img = x.reshape(bsz, hh, ww, cc)
    conv = jax.lax.conv_general_dilated(
        img, weight[:, :, None, :],                 # HWIO, in_per_group = 1
        window_strides=(1, 1), padding="SAME",
        dimension_numbers=("NHWC", "HWIO", "NHWC"),
        feature_group_count=cc)
    conv = conv + bias
    return (conv + img).reshape(bsz, ntok, cc)


if __name__ == "__main__":
    key = jax.random.PRNGKey(0)
    k_x, k_w, k_b = jax.random.split(key, 3)

    x = jax.random.normal(k_x, (B, N, C), dtype=jnp.float32)
    weight = (0.2 * jax.random.normal(k_w, (K, K, C))).astype(jnp.float32)
    bias = (0.02 * jax.random.normal(k_b, (C,))).astype(jnp.float32)

    # One-time packing (out of the per-call hot path).
    w_packed, b_packed = prepare_conv_pos_enc_params(
        weight, bias, (H_IMG, W_IMG), batch_block=B)

    out = jax.block_until_ready(
        conv_pos_enc_pallas(x, w_packed, b_packed, (H_IMG, W_IMG)))
    assert out.shape == (B, N, C)

    ref = jax.block_until_ready(conv_pos_enc_ref(x, weight, bias, (H_IMG, W_IMG)))
    np.testing.assert_allclose(np.asarray(out), np.asarray(ref), rtol=1e-5, atol=1e-5)
    print("KERNEL_OK")
</pallas_src>

<mosaic_0001>
module attributes {stable_mosaic.version = 11 : i64} {
  func.func @_conv_pos_enc_kernel(%arg0: i32, %arg1: memref<16x256xf32, #tpu.memory_space<vmem>>, %arg2: memref<9x16x256xf32, #tpu.memory_space<vmem>>, %arg3: memref<1x256xf32, #tpu.memory_space<vmem>>, %arg4: memref<16x256xf32, #tpu.memory_space<vmem>>) attributes {dimension_semantics = [#tpu.dimension_semantics<parallel>], iteration_bounds = array<i64: 1>, scalar_prefetch = 0 : i64, scratch_operands = 0 : i64, tpu.core_type = #tpu.core_type<tc>, window_params = [{transform_indices = @transform_0, window_bounds = array<i64: 16, 256>}, {pipeline_mode = #tpu.pipeline_mode<synchronous>, transform_indices = @transform_1, window_bounds = array<i64: 9, 16, 256>}, {pipeline_mode = #tpu.pipeline_mode<synchronous>, transform_indices = @transform_2, window_bounds = array<i64: 1, 256>}, {transform_indices = @transform_3, window_bounds = array<i64: 16, 256>}]} {
    %c0 = arith.constant 0 : index
    %c0_0 = arith.constant 0 : index
    %0 = vector.load %arg1[%c0, %c0_0] : memref<16x256xf32, #tpu.memory_space<vmem>>, vector<16x256xf32>
    %c0_1 = arith.constant 0 : index
    %c0_2 = arith.constant 0 : index
    %c0_3 = arith.constant 0 : index
    %1 = vector.load %arg2[%c0_1, %c0_2, %c0_3] : memref<9x16x256xf32, #tpu.memory_space<vmem>>, vector<9x16x256xf32>
    %cst = arith.constant 0.000000e+00 : f32
    %2 = vector.broadcast %cst : f32 to vector<16x256xf32>
    %c1_i32 = arith.constant 1 : i32
    %3 = tpu.dynamic_rotate %0 by %c1_i32 dim 0 : vector<16x256xf32>, i32 -> vector<16x256xf32>
    %c32_i32 = arith.constant 32 : i32
    %4 = tpu.dynamic_rotate %3 by %c32_i32 dim 1 : vector<16x256xf32>, i32 -> vector<16x256xf32>
    %5 = vector.extract_strided_slice %1 {offsets = [0, 0, 0], sizes = [1, 16, 256], strides = [1, 1, 1]} : vector<9x16x256xf32> to vector<1x16x256xf32>
    %6 = vector.shape_cast %5 : vector<1x16x256xf32> to vector<16x256xf32>
    %7 = arith.mulf %4, %6 : vector<16x256xf32>
    %8 = arith.addf %2, %7 : vector<16x256xf32>
    %9 = vector.extract_strided_slice %1 {offsets = [1, 0, 0], sizes = [1, 16, 256], strides = [1, 1, 1]} : vector<9x16x256xf32> to vector<1x16x256xf32>
    %10 = vector.shape_cast %9 : vector<1x16x256xf32> to vector<16x256xf32>
    %11 = arith.mulf %3, %10 : vector<16x256xf32>
    %12 = arith.addf %8, %11 : vector<16x256xf32>
    %c224_i32 = arith.constant 224 : i32
    %13 = tpu.dynamic_rotate %3 by %c224_i32 dim 1 : vector<16x256xf32>, i32 -> vector<16x256xf32>
    %14 = vector.extract_strided_slice %1 {offsets = [2, 0, 0], sizes = [1, 16, 256], strides = [1, 1, 1]} : vector<9x16x256xf32> to vector<1x16x256xf32>
    %15 = vector.shape_cast %14 : vector<1x16x256xf32> to vector<16x256xf32>
    %16 = arith.mulf %13, %15 : vector<16x256xf32>
    %17 = arith.addf %12, %16 : vector<16x256xf32>
    %c32_i32_4 = arith.constant 32 : i32
    %18 = tpu.dynamic_rotate %0 by %c32_i32_4 dim 1 : vector<16x256xf32>, i32 -> vector<16x256xf32>
    %19 = vector.extract_strided_slice %1 {offsets = [3, 0, 0], sizes = [1, 16, 256], strides = [1, 1, 1]} : vector<9x16x256xf32> to vector<1x16x256xf32>
    %20 = vector.shape_cast %19 : vector<1x16x256xf32> to vector<16x256xf32>
    %21 = arith.mulf %18, %20 : vector<16x256xf32>
    %22 = arith.addf %17, %21 : vector<16x256xf32>
    %23 = vector.extract_strided_slice %1 {offsets = [4, 0, 0], sizes = [1, 16, 256], strides = [1, 1, 1]} : vector<9x16x256xf32> to vector<1x16x256xf32>
    %24 = vector.shape_cast %23 : vector<1x16x256xf32> to vector<16x256xf32>
    %25 = arith.mulf %0, %24 : vector<16x256xf32>
    %26 = arith.addf %22, %25 : vector<16x256xf32>
    %c224_i32_5 = arith.constant 224 : i32
    %27 = tpu.dynamic_rotate %0 by %c224_i32_5 dim 1 : vector<16x256xf32>, i32 -> vector<16x256xf32>
    %28 = vector.extract_strided_slice %1 {offsets = [5, 0, 0], sizes = [1, 16, 256], strides = [1, 1, 1]} : vector<9x16x256xf32> to vector<1x16x256xf32>
    %29 = vector.shape_cast %28 : vector<1x16x256xf32> to vector<16x256xf32>
    %30 = arith.mulf %27, %29 : vector<16x256xf32>
    %31 = arith.addf %26, %30 : vector<16x256xf32>
    %c15_i32 = arith.constant 15 : i32
    %32 = tpu.dynamic_rotate %0 by %c15_i32 dim 0 : vector<16x256xf32>, i32 -> vector<16x256xf32>
    %c32_i32_6 = arith.constant 32 : i32
    %33 = tpu.dynamic_rotate %32 by %c32_i32_6 dim 1 : vector<16x256xf32>, i32 -> vector<16x256xf32>
    %34 = vector.extract_strided_slice %1 {offsets = [6, 0, 0], sizes = [1, 16, 256], strides = [1, 1, 1]} : vector<9x16x256xf32> to vector<1x16x256xf32>
    %35 = vector.shape_cast %34 : vector<1x16x256xf32> to vector<16x256xf32>
    %36 = arith.mulf %33, %35 : vector<16x256xf32>
    %37 = arith.addf %31, %36 : vector<16x256xf32>
    %38 = vector.extract_strided_slice %1 {offsets = [7, 0, 0], sizes = [1, 16, 256], strides = [1, 1, 1]} : vector<9x16x256xf32> to vector<1x16x256xf32>
    %39 = vector.shape_cast %38 : vector<1x16x256xf32> to vector<16x256xf32>
    %40 = arith.mulf %32, %39 : vector<16x256xf32>
    %41 = arith.addf %37, %40 : vector<16x256xf32>
    %c224_i32_7 = arith.constant 224 : i32
    %42 = tpu.dynamic_rotate %32 by %c224_i32_7 dim 1 : vector<16x256xf32>, i32 -> vector<16x256xf32>
    %43 = vector.extract_strided_slice %1 {offsets = [8, 0, 0], sizes = [1, 16, 256], strides = [1, 1, 1]} : vector<9x16x256xf32> to vector<1x16x256xf32>
    %44 = vector.shape_cast %43 : vector<1x16x256xf32> to vector<16x256xf32>
    %45 = arith.mulf %42, %44 : vector<16x256xf32>
    %46 = arith.addf %41, %45 : vector<16x256xf32>
    %47 = arith.addf %0, %46 : vector<16x256xf32>
    %c0_8 = arith.constant 0 : index
    %c0_9 = arith.constant 0 : index
    %48 = vector.load %arg3[%c0_8, %c0_9] : memref<1x256xf32, #tpu.memory_space<vmem>>, vector<1x256xf32>
    %49 = vector.broadcast %48 : vector<1x256xf32> to vector<16x256xf32>
    %50 = arith.addf %47, %49 : vector<16x256xf32>
    %c0_10 = arith.constant 0 : index
    %c0_11 = arith.constant 0 : index
    %51 = vector.load %arg4[%c0_10, %c0_11] : memref<16x256xf32, #tpu.memory_space<vmem>>, vector<16x256xf32>
    tpu.vector_store %arg4[%c0_10, %c0_11], %50 {strides = array<i32>} : memref<16x256xf32, #tpu.memory_space<vmem>>, vector<16x256xf32>,
    return
  }
  func.func @transform_0(%arg0: i32) -> (i32, i32) {
    %c0_i32 = arith.constant 0 : i32
    %c0_i32_0 = arith.constant 0 : i32
    return %arg0, %c0_i32 : i32, i32
  }
  func.func @transform_1(%arg0: i32) -> (i32, i32, i32) {
    %c0_i32 = arith.constant 0 : i32
    %c0_i32_0 = arith.constant 0 : i32
    %c0_i32_1 = arith.constant 0 : i32
    %c0_i32_2 = arith.constant 0 : i32
    return %c0_i32, %c0_i32_0, %c0_i32_1 : i32, i32, i32
  }
  func.func @transform_2(%arg0: i32) -> (i32, i32) {
    %c0_i32 = arith.constant 0 : i32
    %c0_i32_0 = arith.constant 0 : i32
    %c0_i32_1 = arith.constant 0 : i32
    return %c0_i32, %c0_i32_0 : i32, i32
  }
  func.func @transform_3(%arg0: i32) -> (i32, i32) {
    %c0_i32 = arith.constant 0 : i32
    %c0_i32_0 = arith.constant 0 : i32
    return %arg0, %c0_i32 : i32, i32
  }
}

</mosaic_0001>

<bundles_post_ra>
// kernel: tpu_custom_call.1
= control target key start
LH: loop header
LB: loop body
LE: loop exit
PB: predicated region body
PF: predicated region fallthrough
CT: control target
= control target key end

     0   :  { %8 = vsyncpa [#allocation3], 0  ;;  %s593_s0 = inlined_call_operand.hbm [shape: f32[16,256], index: 0, kind: input, shape index: {}]   ;;  %s594_s1 = inlined_call_operand.hbm [shape: f32[9,16,256], index: 1, kind: input, shape index: {}]   ;;  %s595_s2 = inlined_call_operand.hbm [shape: f32[1,256], index: 2, kind: input, shape index: {}]   ;;  %s596_s3 = inlined_call_operand.hbm [shape: f32[16,256], index: 3, kind: output, shape index: {}]  }
   0x1   :  { %9 = vsyncpa [#allocation6], 0 }
   0x2   :  { %10 = vsyncpa [#allocation4], 0  ;;  %s28_s14 = sshll.u32 %s594_s1, 4  ;;  %s416_s15 = smov [#allocation5]   ;;  %s29_s14 = int_to_ptr.hbm [resolvable:$true] %s28_s14 }
   0x3   :  { %s30_s16 = sshll.u32 %s416_s15, 4  ;;  %s15_s19 = sshll.u32 %s593_s0, 4  ;;  %s31_s16 = int_to_ptr.vmem [resolvable:$true] %s30_s16  ;;  %s16_s19 = int_to_ptr.hbm [resolvable:$true] %s15_s19 }
   0x4   :  { %s417_s20 = smov 256   ;;  %s418_s21 = smov 16  }
   0x5   :  { %36 = dma.hbm_to_vmem [thread:$0]  %s29_s14, 4608, %s31_s16, [#allocation6], %s417_s20, %s417_s20, %s418_s21  }
   0x6   :  { %s419_s22 = smov [#allocation2]   ;;  %s42_s1 = sshll.u32 %s595_s2, 4  ;;  %s43_s1 = int_to_ptr.hbm [resolvable:$true] %s42_s1 }
   0x7   :  { %s17_s23 = sshll.u32 %s419_s22, 4  ;;  %s420_s0 = smov [#allocation7]   ;;  %s18_s23 = int_to_ptr.vmem [resolvable:$true] %s17_s23 }
   0x8   :  { %23 = dma.hbm_to_vmem [thread:$0]  %s16_s19, 512, %s18_s23, [#allocation3], %s417_s20, %s417_s20, %s418_s21  }
   0x9   :  { %s44_s26 = sshll.u32 %s420_s0, 4  ;;  %s45_s26 = int_to_ptr.vmem [resolvable:$true] %s44_s26 }
   0xa   :  { %47 = dma.hbm_to_vmem [thread:$0]  %s43_s1, 32, %s45_s26, [#allocation6]  }
   0xb   :  { %410 = dma.done.wait [#allocation3], 512  }
   0xc   :  { %411 = vsyncadd [#allocation3], 4294966784 }
   0xd   :  { %412 = dma.done.wait [#allocation6], 4640  }
   0xe   :  { %413 = vsyncadd [#allocation6], 4294962656  ;;  %v104_v0 = vlaneseq  ;;  %v459_v2 = vld [vmem:[#allocation2 + $0x8] sm:$0xff]  ;;  %v461_v3 = vld [vmem:[#allocation2 + $0x18] sm:$0xff]  ;;  %s421_s2 = smov 32   ;;  %s422_s27 = smov 96  }
   0xf   :  { %v101_v4 = vrot.slane %v459_v2, 7  ;;  %v103_v5 = vrot.slane %v461_v3, 7  ;;  %v465_v6 = vld [vmem:[#allocation2] sm:$0xff]  ;;  %v467_v7 = vld [vmem:[#allocation2 + $0x10] sm:$0xff]  ;;  %v212_v18 = vrot.slane %v459_v2, 1  ;;  %v214_v19 = vrot.slane %v461_v3, 1 }
  0x10   :  { %v105_v1 = vshrl.u32 %v104_v0, 7  ;;  %v100_v8 = vrot.slane %v465_v6, 7  ;;  %v102_v9 = vrot.slane %v467_v7, 7  ;;  %v211_v14 = vrot.slane %v465_v6, 1  ;;  %v69_v25 = vld [vmem:[#allocation5 + $0x28] sm:$0xff]  ;;  %v68_v26 = vld [vmem:[#allocation5 + $0x20] sm:$0xff] }
  0x11   :  { %v213_v15 = vrot.slane %v467_v7, 1  ;;  %v523_v23 = vand.u32 127, %v104_v0  ;;  %v64_v28 = vld [vmem:[#allocation5] sm:$0xff]  ;;  %v65_v29 = vld [vmem:[#allocation5 + $0x8] sm:$0xff]  ;;  %v71_v40 = vld [vmem:[#allocation5 + $0x38] sm:$0xff]  ;;  %s423_s28 = smov [#allocation8]  }
  0x12   :  { %vm106_vm0 = vcmp.lt.s32.totalorder %v105_v1, 1  ;;  %vm215_vm1 = vcmp.lt.s32.totalorder %v105_v1, 7  ;;  %v70_v41 = vld [vmem:[#allocation5 + $0x30] sm:$0xff]  ;;  %v67_v44 = vld [vmem:[#allocation5 + $0x18] sm:$0xff]  ;;  %v72_v58 = vld [vmem:[#allocation5 + $0x40] sm:$0xff]  ;;  %s290_s29 = sshll.u32 %s423_s28, 4  ;;  %s291_s29 = int_to_ptr.vmem [resolvable:$true] %s290_s29 }
  0x13   :  { %v110_v10 = vsel %vm106_vm0, %v103_v5, %v101_v4  ;;  %v109_v11 = vsel %vm106_vm0, %v102_v9, %v100_v8  ;;  %v108_v12 = vsel %vm106_vm0, %v101_v4, %v103_v5  ;;  %v107_v13 = vsel %vm106_vm0, %v100_v8, %v102_v9  ;;  %v66_v43 = vld [vmem:[#allocation5 + $0x10] sm:$0xff]  ;;  %v75_v55 = vld [vmem:[#allocation5 + $0x58] sm:$0xff]  ;;  %v73_v59 = vld [vmem:[#allocation5 + $0x48] sm:$0xff]  ;;  %s292_s5 = sshll.u32 %s596_s3, 4  ;;  %s293_s5 = int_to_ptr.hbm [resolvable:$true] %s292_s5 }
  0x14   :  { %115 = vrot.lane.b32.xlu1 %v110_v10, %s421_s2  ;;  %111 = vrot.lane.b32.xlu0 %v109_v11, %s421_s2  ;;  %v495_v16 = vsel %vm215_vm1, %v211_v14, %v213_v15  ;;  %v499_v17 = vsel %vm215_vm1, %v213_v15, %v211_v14  ;;  %v507_v20 = vsel %vm215_vm1, %v214_v19, %v212_v18  ;;  %vm121_vm2 = vcmp.lt.s32.totalorder %v523_v23, 32  ;;  %v74_v54 = vld [vmem:[#allocation5 + $0x50] sm:$0xff]  ;;  %v77_v14 = vld [vmem:[#allocation5 + $0x68] sm:$0xff] }
  0x15   :  { %142 = vrot.lane.b32.xlu2 %v109_v11, %s422_s27  ;;  %v509_v21 = vsel %vm215_vm1, %v212_v18, %v214_v19  ;;  %v135_v30 = vmul.f32 %v110_v10, %v69_v25  ;;  %v134_v31 = vmul.f32 %v109_v11, %v68_v26  ;;  %v137_v45 = vmul.f32 %v108_v12, %v71_v40  ;;  %v78_v18 = vld [vmem:[#allocation5 + $0x70] sm:$0xff]  ;;  %v79_v19 = vld [vmem:[#allocation5 + $0x78] sm:$0xff] }
  0x16   :  { %v136_v46 = vmul.f32 %v107_v13, %v70_v41  ;;  %vm150_vm3 = vcmp.lt.s32.totalorder %v523_v23, 96 }
  0x1c   :  { %117 = vrot.lane.b32.xlu1 %v108_v12, %s421_s2  ;;  %113 = vrot.lane.b32.xlu0 %v107_v13, %s421_s2 }
  0x1d   :  { %144 = vrot.lane.b32.xlu2 %v107_v13, %s422_s27  ;;  %v76_v13 = vld [vmem:[#allocation5 + $0x60] sm:$0xff] }
  0x24   :  { %148 = vrot.lane.b32.xlu1 %v108_v12, %s422_s27  ;;  %146 = vrot.lane.b32.xlu0 %v110_v10, %s422_s27 }
  0x25   :  { %163 = vrot.lane.b32.xlu2 %v465_v6, %s421_s2 }
  0x2c   :  { %167 = vrot.lane.b32.xlu1 %v459_v2, %s421_s2  ;;  %165 = vrot.lane.b32.xlu0 %v467_v7, %s421_s2 }
  0x2d   :  { %169 = vrot.lane.b32.xlu2 %v461_v3, %s421_s2 }
  0x34   :  { %193 = vrot.lane.b32.xlu1 %v467_v7, %s422_s27  ;;  %191 = vrot.lane.b32.xlu0 %v465_v6, %s422_s27 }
  0x35   :  { %195 = vrot.lane.b32.xlu2 %v459_v2, %s422_s27 }
  0x3c   :  { %220 = vrot.lane.b32.xlu1 %v495_v16, %s421_s2  ;;  %197 = vrot.lane.b32.xlu0 %v461_v3, %s422_s27 }
  0x3d   :  { %222 = vrot.lane.b32.xlu2 %v499_v17, %s421_s2 }
  0x44   :  { %226 = vrot.lane.b32.xlu1 %v507_v20, %s421_s2  ;;  %224 = vrot.lane.b32.xlu0 %v509_v21, %s421_s2 }
  0x45   :  { %248 = vrot.lane.b32.xlu2 %v495_v16, %s422_s27 }
  0x4c   :  { %252 = vrot.lane.b32.xlu1 %v509_v21, %s422_s27  ;;  %250 = vrot.lane.b32.xlu0 %v499_v17, %s422_s27 }
  0x4d   :  { %254 = vrot.lane.b32.xlu2 %v507_v20, %s422_s27 }
  0x6f   :  { %v143_v22 = vpop.permute.xlu2 %142 }
  0x77   :  { %v145_v24 = vpop.permute.xlu2 %144 }
  0x7f   :  { %v164_v39 = vpop.permute.xlu2 %163 }
  0x86   :  { %v116_v27 = vpop.permute.xlu1 %115  ;;  %v112_v32 = vpop.permute.xlu0 %111 }
  0x87   :  { %v122_v33 = vsel %vm121_vm2, %v112_v32, %v116_v27  ;;  %v124_v34 = vsel %vm121_vm2, %v116_v27, %v112_v32  ;;  %v170_v56 = vpop.permute.xlu2 %169 }
  0x88   :  { %v126_v35 = vmul.f32 %v124_v34, %v64_v28  ;;  %v127_v36 = vmul.f32 %v122_v33, %v65_v29 }
  0x8a   :  { %v138_v37 = vadd.f32 %v134_v31, %v126_v35  ;;  %v139_v38 = vadd.f32 %v135_v30, %v127_v36  ;;  %v80_v35 = vld [vmem:[#allocation5 + $0x80] sm:$0xff]  ;;  %v81_v36 = vld [vmem:[#allocation5 + $0x88] sm:$0xff] }
  0x8b   :  { %v184_v40 = vmul.f32 %v81_v36, %v459_v2 }
  0x8e   :  { %v118_v42 = vpop.permute.xlu1 %117  ;;  %v114_v47 = vpop.permute.xlu0 %113 }
  0x8f   :  { %v123_v48 = vsel %vm121_vm2, %v114_v47, %v118_v42  ;;  %v125_v49 = vsel %vm121_vm2, %v118_v42, %v114_v47  ;;  %v196_v27 = vpop.permute.xlu2 %195  ;;  %v84_v42 = vld [vmem:[#allocation5 + $0xa0] sm:$0xff] }
  0x90   :  { %v128_v50 = vmul.f32 %v125_v49, %v66_v43  ;;  %v129_v51 = vmul.f32 %v123_v48, %v67_v44  ;;  %v85_v43 = vld [vmem:[#allocation5 + $0xa8] sm:$0xff] }
  0x92   :  { %v140_v52 = vadd.f32 %v136_v46, %v128_v50  ;;  %v141_v53 = vadd.f32 %v137_v45, %v129_v51 }
  0x96   :  { %v149_v57 = vpop.permute.xlu1 %148  ;;  %v147_v62 = vpop.permute.xlu0 %146 }
  0x97   :  { %v152_v60 = vsel %vm150_vm3, %v145_v24, %v149_v57  ;;  %v154_v61 = vsel %vm150_vm3, %v149_v57, %v145_v24  ;;  %v151_v1 = vsel %vm150_vm3, %v143_v22, %v147_v62  ;;  %v153_v4 = vsel %vm150_vm3, %v147_v62, %v143_v22  ;;  %v223_v51 = vpop.permute.xlu2 %222 }
  0x98   :  { %v157_v63 = vmul.f32 %v152_v60, %v74_v54  ;;  %v158_v0 = vmul.f32 %v154_v61, %v75_v55  ;;  %v155_v5 = vmul.f32 %v151_v1, %v72_v58  ;;  %v156_v8 = vmul.f32 %v153_v4, %v73_v59  ;;  %v86_v59 = vld [vmem:[#allocation5 + $0xb0] sm:$0xff]  ;;  %v87_v60 = vld [vmem:[#allocation5 + $0xb8] sm:$0xff] }
  0x9a   :  { %v161_v9 = vadd.f32 %v157_v63, %v140_v52  ;;  %v162_v10 = vadd.f32 %v158_v0, %v141_v53  ;;  %v159_v11 = vadd.f32 %v155_v5, %v138_v37  ;;  %v160_v12 = vadd.f32 %v156_v8, %v139_v38  ;;  %v82_v52 = vld [vmem:[#allocation5 + $0x90] sm:$0xff]  ;;  %v83_v53 = vld [vmem:[#allocation5 + $0x98] sm:$0xff] }
  0x9b   :  { %v186_v57 = vmul.f32 %v83_v53, %v461_v3 }
  0x9e   :  { %v168_v15 = vpop.permute.xlu1 %167  ;;  %v166_v26 = vpop.permute.xlu0 %165 }
  0x9f   :  { %v171_v24 = vsel %vm121_vm2, %v164_v39, %v168_v15  ;;  %v173_v25 = vsel %vm121_vm2, %v168_v15, %v164_v39  ;;  %v172_v29 = vsel %vm121_vm2, %v166_v26, %v170_v56  ;;  %v174_v30 = vsel %vm121_vm2, %v170_v56, %v166_v26  ;;  %v91_v15 = vld [vmem:[#allocation5 + $0xd8] sm:$0xff] }
  0xa0   :  { %v175_v22 = vmul.f32 %v173_v25, %v76_v13  ;;  %v176_v28 = vmul.f32 %v171_v24, %v77_v14  ;;  %v177_v31 = vmul.f32 %v174_v30, %v78_v18  ;;  %v178_v32 = vmul.f32 %v172_v29, %v79_v19  ;;  %v92_v13 = vld [vmem:[#allocation5 + $0xe0] sm:$0xff]  ;;  %v90_v14 = vld [vmem:[#allocation5 + $0xd0] sm:$0xff]  ;;  %v93_v18 = vld [vmem:[#allocation5 + $0xe8] sm:$0xff] }
  0xa1   :  { %v183_v39 = vmul.f32 %v80_v35, %v465_v6  ;;  %v185_v56 = vmul.f32 %v82_v52, %v467_v7  ;;  %v88_v24 = vld [vmem:[#allocation5 + $0xc0] sm:$0xff]  ;;  %v89_v25 = vld [vmem:[#allocation5 + $0xc8] sm:$0xff] }
  0xa2   :  { %v179_v33 = vadd.f32 %v175_v22, %v159_v11  ;;  %v180_v34 = vadd.f32 %v176_v28, %v160_v12  ;;  %v181_v37 = vadd.f32 %v177_v31, %v161_v9  ;;  %v182_v38 = vadd.f32 %v178_v32, %v162_v10  ;;  %v249_v10 = vpop.permute.xlu2 %248  ;;  %v95_v11 = vld [vmem:[#allocation5 + $0xf8] sm:$0xff]  ;;  %v94_v12 = vld [vmem:[#allocation5 + $0xf0] sm:$0xff] }
  0xa3   :  { %v243_v26 = vmul.f32 %v507_v20, %v95_v11  ;;  %v241_v20 = vmul.f32 %v509_v21, %v93_v18 }
  0xa4   :  { %v187_v47 = vadd.f32 %v183_v39, %v179_v33  ;;  %v188_v48 = vadd.f32 %v184_v40, %v180_v34  ;;  %v190_v0 = vadd.f32 %v186_v57, %v182_v38  ;;  %v189_v1 = vadd.f32 %v185_v56, %v181_v37 }
  0xa5   :  { %v240_v34 = vmul.f32 %v495_v16, %v92_v13 }
  0xa6   :  { %v194_v41 = vpop.permute.xlu1 %193  ;;  %v192_v44 = vpop.permute.xlu0 %191 }
  0xa7   :  { %v199_v45 = vsel %vm150_vm3, %v192_v44, %v196_v27  ;;  %v201_v46 = vsel %vm150_vm3, %v196_v27, %v192_v44  ;;  %v242_v27 = vmul.f32 %v499_v17, %v94_v12 }
  0xa8   :  { %v203_v49 = vmul.f32 %v199_v45, %v84_v42  ;;  %v204_v50 = vmul.f32 %v201_v46, %v85_v43  ;;  %v96_v42 = vld [vmem:[#allocation5 + $0x100] sm:$0xff]  ;;  %v97_v43 = vld [vmem:[#allocation5 + $0x108] sm:$0xff] }
  0xaa   :  { %v207_v54 = vadd.f32 %v203_v49, %v187_v47  ;;  %v208_v55 = vadd.f32 %v204_v50, %v188_v48  ;;  %v255_v46 = vpop.permute.xlu2 %254  ;;  %v98_v48 = vld [vmem:[#allocation5 + $0x110] sm:$0xff]  ;;  %v99_v49 = vld [vmem:[#allocation5 + $0x118] sm:$0xff]  ;;  %v272_v50 = vld [vmem:[#allocation7] sm:$0x3] }
  0xae   :  { %v221_v58 = vpop.permute.xlu1 %220  ;;  %v198_v61 = vpop.permute.xlu0 %197 }
  0xaf   :  { %v200_v62 = vsel %vm150_vm3, %v194_v41, %v198_v61  ;;  %v202_v63 = vsel %vm150_vm3, %v198_v61, %v194_v41 }
  0xb0   :  { %v205_v4 = vmul.f32 %v200_v62, %v86_v59  ;;  %v206_v5 = vmul.f32 %v202_v63, %v87_v60  ;;  %v275_v59 = vperm.slane %v272_v50, 1 }
  0xb2   :  { %v209_v8 = vadd.f32 %v205_v4, %v189_v1  ;;  %v210_v9 = vadd.f32 %v206_v5, %v190_v0 }
  0xb6   :  { %v227_v19 = vpop.permute.xlu1 %226  ;;  %v225_v29 = vpop.permute.xlu0 %224 }
  0xb7   :  { %v229_v22 = vsel %vm121_vm2, %v223_v51, %v227_v19  ;;  %v231_v28 = vsel %vm121_vm2, %v227_v19, %v223_v51  ;;  %v228_v32 = vsel %vm121_vm2, %v221_v58, %v225_v29  ;;  %v230_v33 = vsel %vm121_vm2, %v225_v29, %v221_v58 }
  0xb8   :  { %v234_v30 = vmul.f32 %v231_v28, %v90_v14  ;;  %v235_v31 = vmul.f32 %v229_v22, %v91_v15  ;;  %v232_v17 = vmul.f32 %v230_v33, %v88_v24  ;;  %v233_v35 = vmul.f32 %v228_v32, %v89_v25 }
  0xb9   :  { %v274_v58 = vperm.slane %v272_v50, 0 }
  0xba   :  { %v238_v36 = vadd.f32 %v234_v30, %v209_v8  ;;  %v239_v37 = vadd.f32 %v235_v31, %v210_v9  ;;  %v236_v38 = vadd.f32 %v232_v17, %v207_v54  ;;  %v237_v39 = vadd.f32 %v233_v35, %v208_v55 }
  0xbc   :  { %v247_v40 = vadd.f32 %v243_v26, %v239_v37  ;;  %v246_v41 = vadd.f32 %v242_v27, %v238_v36  ;;  %v244_v44 = vadd.f32 %v240_v34, %v236_v38  ;;  %v245_v45 = vadd.f32 %v241_v20, %v237_v39 }
  0xbe   :  { %v253_v47 = vpop.permute.xlu1 %252  ;;  %v251_v51 = vpop.permute.xlu0 %250 }
  0xbf   :  { %v256_v16 = vsel %vm150_vm3, %v249_v10, %v253_v47  ;;  %v258_v21 = vsel %vm150_vm3, %v253_v47, %v249_v10  ;;  %v257_v54 = vsel %vm150_vm3, %v251_v51, %v255_v46  ;;  %v259_v55 = vsel %vm150_vm3, %v255_v46, %v251_v51 }
  0xc0   :  { %v260_v52 = vmul.f32 %v256_v16, %v96_v42  ;;  %v261_v53 = vmul.f32 %v258_v21, %v97_v43  ;;  %v262_v56 = vmul.f32 %v257_v54, %v98_v48  ;;  %v263_v57 = vmul.f32 %v259_v55, %v99_v49 }
  0xc2   :  { %v264_v60 = vadd.f32 %v260_v52, %v244_v44  ;;  %v265_v61 = vadd.f32 %v261_v53, %v245_v45  ;;  %v266_v62 = vadd.f32 %v262_v56, %v246_v41  ;;  %v267_v63 = vadd.f32 %v263_v57, %v247_v40 }
  0xc4   :  { %v268_v0 = vadd.f32 %v264_v60, %v465_v6  ;;  %v269_v1 = vadd.f32 %v265_v61, %v459_v2  ;;  %v270_v4 = vadd.f32 %v266_v62, %v467_v7  ;;  %v271_v5 = vadd.f32 %v267_v63, %v461_v3 }
  0xc6   :  { %v278_v8 = vadd.f32 %v274_v58, %v268_v0  ;;  %v279_v9 = vadd.f32 %v275_v59, %v269_v1  ;;  %v280_v23 = vadd.f32 %v274_v58, %v270_v4  ;;  %v281_v10 = vadd.f32 %v275_v59, %v271_v5 }
  0xc8   :  { %282 = vst [vmem:[#allocation8] sm:$0xff] %v278_v8 }
  0xc9   :  { %283 = vst [vmem:[#allocation8 + $0x8] sm:$0xff] %v279_v9 }
  0xca   :  { %284 = vst [vmem:[#allocation8 + $0x10] sm:$0xff] %v280_v23 }
  0xcb   :  { %285 = vst [vmem:[#allocation8 + $0x18] sm:$0xff] %v281_v10 }
  0xcc   :  { %298 = dma.vmem_to_hbm [thread:$0]  %s291_s29, 512, %s293_s5, [#allocation4], %s417_s20, %s417_s20, %s418_s21  }
  0xcd   :  { %414 = dma.done.wait [#allocation4], 512  }
  0xce   :  { %415 = vsyncadd [#allocation4], 4294966784 }
  0xcf   :  { %303 = vsyncpa [#allocation3], 1 }
  0xd0   :  { %304 = vsyncpa [#allocation6], 1 }
  0xd1   :  { %305 = vsyncpa [#allocation4], 1 }

</bundles_post_ra>
